<compile_context>
chip_gen: v5e
topology: v5e:2x2
jax: 0.10.0
libtpu: 0.0.40
codegen_flags: <defaults>
</compile_context>

<pallas_src>
import jax
import jax.numpy as jnp
from jax.experimental import pallas as pl
from jax.experimental.pallas import tpu as pltpu


def _dropsample_kernel(x_ref, s_ref, o_ref):
    # x_ref: (TB, TN) activation tile.
    # s_ref: (TB, 128) lane-dense per-sample scale (0 or 1/(1-prob)) already in
    #        the activation dtype; only column 0 is meaningful.
    o_ref[...] = x_ref[...] * s_ref[:, 0:1]


def _round_down(v, m):
    return max(m, (v // m) * m)


def _pick_tiles(B, N, itemsize):
    """Generation-aware tile selection for a pure HBM-streaming multiply."""
    try:
        vmem_cap = int(pltpu.get_tpu_info().vmem_capacity_bytes)
    except Exception:
        vmem_cap = 64 * 1024 * 1024  # conservative default (v7x per-TC VMEM)

    # Double-buffered footprint ~= 4x tile (2x in + 2x out). Keep it <= ~48 MiB
    # on 128 MiB parts (v5e/v6e) and <= ~32-40 MiB on 64 MiB v7x.
    budget = min(48 * 1024 * 1024, max(vmem_cap // 2, 16 * 1024 * 1024))
    tile_cap = min(8 * 1024 * 1024, budget // 4)        # bytes per activation tile

    # Sublane packing multiple: f32 -> 8, bf16/f16 -> 16, int8/fp8 -> 32.
    sub = {1: 32, 2: 16}.get(itemsize, 8)

    row_bytes = N * itemsize
    if row_bytes <= tile_cap:
        # Prefer full rows: one fully contiguous DMA per tile, no ragged lane
        # tile / masked stores on the last block.
        TN = N
        rows_fit = max(sub, tile_cap // row_bytes)
        TB = B if B <= rows_fit else _round_down(rows_fit, sub)
    else:
        # A single row group exceeds the budget: split the lane axis.
        TB = B if B <= sub else sub
        TN = _round_down(tile_cap // (TB * itemsize), 128)

    # v7x megacore: guarantee >= 2 grid steps on a "parallel" axis so both
    # TensorCores stream; split rows if sublane-alignable, else lanes.
    if pl.cdiv(B, TB) * pl.cdiv(N, TN) < 2:
        if B >= 2 * sub:
            TB = _round_down(-(-B // 2), sub)       # ~half, sublane aligned
        elif N >= 256 and N % 256 == 0:
            TN = N // 2                              # clean multiple of 128
        # else: too small / awkward to split cleanly -> single step is fine.

    grid = (pl.cdiv(B, TB), pl.cdiv(N, TN))
    footprint = 4 * TB * TN * itemsize + 2 * TB * 128 * itemsize + (2 << 20)
    vmem_limit = int(min(max(footprint, 8 * 1024 * 1024),
                         vmem_cap - 8 * 1024 * 1024))
    return TB, TN, grid, vmem_limit


def dropsample(x, key, prob=0.0, training=True, donate=False,
               min_pallas_bytes=1 << 20):
    """JAX/Pallas equivalent of Dropsample.forward."""
    if prob == 0.0 or not training:
        return x
    if prob >= 1.0:
        # u in [0,1) is never > 1.0: every sample dropped (avoid 1/(1-prob)=1/0).
        return jnp.zeros_like(x)

    B = x.shape[0]
    N = 1
    for d in x.shape[1:]:
        N *= d
    x2 = x.reshape(B, N)

    # One uniform per sample; fold keep-compare and 1/(1-prob) into a scale.
    # NOTE: the scale is cast to x.dtype before the multiply (bf16 rounds it).
    u = jax.random.uniform(key, (B, 1), dtype=jnp.float32)
    scale = jnp.where(u > prob, 1.0 / (1.0 - prob), 0.0).astype(x.dtype)

    itemsize = jnp.dtype(x.dtype).itemsize
    if B * N * itemsize < min_pallas_bytes:
        # Tiny tensors: kernel dispatch + grid-step overhead dominates; a fused
        # XLA elementwise multiply is strictly cheaper.
        return (x2 * scale).reshape(x.shape)

    scale_wide = jnp.broadcast_to(scale, (B, 128))   # lane-dense, no width-1 DMA

    TB, TN, grid, vmem_limit = _pick_tiles(B, N, itemsize)

    out = pl.pallas_call(
        _dropsample_kernel,
        out_shape=jax.ShapeDtypeStruct((B, N), x.dtype),
        grid=grid,
        in_specs=[
            pl.BlockSpec((TB, TN), lambda i, j: (i, j)),    # activations
            pl.BlockSpec((TB, 128), lambda i, j: (i, 0)),   # per-sample scale
        ],
        out_specs=pl.BlockSpec((TB, TN), lambda i, j: (i, j)),
        # Only alias in place when the caller guarantees donation; otherwise a
        # must-alias forces XLA to defensively copy the operand (~2x HBM).
        input_output_aliases=({0: 0} if donate else {}),
        compiler_params=pltpu.CompilerParams(
            dimension_semantics=("parallel", "parallel"),
            vmem_limit_bytes=vmem_limit,
        ),
    )(x2, scale_wide)
    return out.reshape(x.shape)


def _reference(x, key, prob):
    """Pure-JAX reference with identical uniforms / arithmetic."""
    B = x.shape[0]
    u = jax.random.uniform(key, (B, 1), dtype=jnp.float32)
    scale = jnp.where(u > prob, 1.0 / (1.0 - prob), 0.0).astype(x.dtype)
    return x * scale.reshape((B,) + (1,) * (x.ndim - 1))


if __name__ == "__main__":
    key = jax.random.PRNGKey(0)
    kx, kmask, kx2, kmask2, kx3, kmask3 = jax.random.split(key, 6)
    prob = 0.25

    # Shape implied by the module (B, C, H, W).
    B, C, H, W = 2, 4, 16, 16
    x = jax.random.normal(kx, (B, C, H, W), dtype=jnp.float32)

    # Pallas path (force past the tiny-input fallback so the kernel runs).
    y = jax.block_until_ready(
        dropsample(x, kmask, prob=prob, training=True, min_pallas_bytes=0))
    ref = _reference(x, kmask, prob)
    assert jnp.allclose(y, ref, rtol=1e-6, atol=1e-6), "mismatch vs reference"

    # Default tiny-input path (XLA fallback) must match too.
    y_fb = jax.block_until_ready(dropsample(x, kmask, prob=prob, training=True))
    assert jnp.allclose(y_fb, ref, rtol=1e-6, atol=1e-6), "fallback mismatch"

    # Eval / prob==0 paths are identity.
    assert jnp.array_equal(dropsample(x, kmask, prob=prob, training=False), x)
    assert jnp.array_equal(dropsample(x, kmask, prob=0.0, training=True), x)

    # Second shape: full-row contiguous tiles (TN = N = 5120) with a lane split
    # to guarantee >= 2 grid steps.
    B2, C2, H2, W2 = 4, 5, 32, 32
    xb = jax.random.normal(kx2, (B2, C2, H2, W2), dtype=jnp.float32)
    y2 = jax.block_until_ready(
        dropsample(xb, kmask2, prob=prob, training=True, min_pallas_bytes=0))
    assert jnp.allclose(y2, _reference(xb, kmask2, prob),
                        rtol=1e-6, atol=1e-6), "mismatch vs reference (tiled)"

    # bf16 path (scale rounded to bf16 in both kernel and reference).
    xc = jax.random.normal(kx3, (B, C, H, W), dtype=jnp.bfloat16)
    y3 = jax.block_until_ready(
        dropsample(xc, kmask3, prob=prob, training=True, min_pallas_bytes=0))
    assert jnp.allclose(y3.astype(jnp.float32),
                        _reference(xc, kmask3, prob).astype(jnp.float32),
                        rtol=1e-2, atol=1e-2), "mismatch vs reference (bf16)"

    # prob >= 1 guard: everything dropped, no division by zero at trace time.
    yz = dropsample(x, kmask, prob=1.0, training=True)
    assert jnp.array_equal(yz, jnp.zeros_like(x))

    print("KERNEL_OK")
</pallas_src>

<mosaic_0001>
module attributes {stable_mosaic.version = 11 : i64} {
  func.func @_dropsample_kernel(%arg0: i32, %arg1: i32, %arg2: memref<2x512xf32, #tpu.memory_space<vmem>>, %arg3: memref<2x128xf32, #tpu.memory_space<vmem>>, %arg4: memref<2x512xf32, #tpu.memory_space<vmem>>) attributes {dimension_semantics = [#tpu.dimension_semantics<parallel>, #tpu.dimension_semantics<parallel>], iteration_bounds = array<i64: 1, 2>, scalar_prefetch = 0 : i64, scratch_operands = 0 : i64, tpu.core_type = #tpu.core_type<tc>, window_params = [{transform_indices = @transform_0, window_bounds = array<i64: 2, 512>}, {transform_indices = @transform_1, window_bounds = array<i64: 2, 128>}, {transform_indices = @transform_2, window_bounds = array<i64: 2, 512>}]} {
    %c0 = arith.constant 0 : index
    %c0_0 = arith.constant 0 : index
    %0 = vector.load %arg2[%c0, %c0_0] : memref<2x512xf32, #tpu.memory_space<vmem>>, vector<2x512xf32>
    %c0_1 = arith.constant 0 : index
    %c0_2 = arith.constant 0 : index
    %1 = vector.load %arg3[%c0_1, %c0_2] : memref<2x128xf32, #tpu.memory_space<vmem>>, vector<2x1xf32>
    %2 = vector.broadcast %1 : vector<2x1xf32> to vector<2x512xf32>
    %3 = arith.mulf %0, %2 : vector<2x512xf32>
    %c0_3 = arith.constant 0 : index
    %c0_4 = arith.constant 0 : index
    %4 = vector.load %arg4[%c0_3, %c0_4] : memref<2x512xf32, #tpu.memory_space<vmem>>, vector<2x512xf32>
    tpu.vector_store %arg4[%c0_3, %c0_4], %3 {strides = array<i32>} : memref<2x512xf32, #tpu.memory_space<vmem>>, vector<2x512xf32>,
    return
  }
  func.func @transform_0(%arg0: i32, %arg1: i32) -> (i32, i32) {
    %c0_i32 = arith.constant 0 : i32
    return %arg0, %arg1 : i32, i32
  }
  func.func @transform_1(%arg0: i32, %arg1: i32) -> (i32, i32) {
    %c0_i32 = arith.constant 0 : i32
    %c0_i32_0 = arith.constant 0 : i32
    return %arg0, %c0_i32 : i32, i32
  }
  func.func @transform_2(%arg0: i32, %arg1: i32) -> (i32, i32) {
    %c0_i32 = arith.constant 0 : i32
    return %arg0, %arg1 : i32, i32
  }
}

</mosaic_0001>

<bundles_post_ra>
// kernel: tpu_custom_call.1
= control target key start
LH: loop header
LB: loop body
LE: loop exit
PB: predicated region body
PF: predicated region fallthrough
CT: control target
= control target key end

     0   :  { %7 = vsyncpa [#allocation3], 0  ;;  %s742_s0 = inlined_call_operand.hbm [shape: f32[2,1024], index: 0, kind: input, shape index: {}]   ;;  %s743_s1 = inlined_call_operand.hbm [shape: f32[2,128], index: 1, kind: input, shape index: {}]   ;;  %s744_s2 = inlined_call_operand.hbm [shape: f32[2,1024], index: 2, kind: output, shape index: {}]  }
   0x1   :  { %9 = vsyncpa [#allocation3 + $0x1], 0 }
   0x2   :  { %10 = vsyncpa [#allocation6], 0 }
   0x3   :  { %11 = vsyncpa [#allocation4], 0 }
   0x4   :  { %13 = vsyncpa [#allocation4 + $0x1], 0  ;;  %s593_s9 = smov 0   ;;  %s595_s10 = smov 0  }
   0x5   :  { %s597_s11 = smov 0   ;;  %s599_s12 = smov 0  }
   0x6   :  { %s601_s13 = smov 0   ;;  %s603_s14 = smov 0  }
   0x7 LB: > { %s332_s15 = sadd.s32 4294967295, %s573_s14   ;;  %s333_s16 = sadd.s32 4294967294, %s573_s14   ;;  %s573_s14 = sphi %s603_s14, %s19_s14   ;;  %s569_s13 = sphi %s601_s13, %s756_s13   ;;  %s565_s12 = sphi %s599_s12, %s755_s12   ;;  %s561_s11 = sphi %s597_s11, %s754_s11   ;;  %s557_s10 = sphi %s595_s10, %s753_s10   ;;  %s553_s9 = sphi %s593_s9, %s752_s9  }
   0x8   : > { %p53_p0 = scmp.ne.s32.totalorder %s557_s10, %s553_s9  ;;  %p627_p1 = scmp.eq.s32.totalorder %s332_s15, 0 }
   0x9   : > { %p631_p2 = scmp.eq.s32.totalorder %s332_s15, 1  ;;  %p111_p3 = scmp.eq.s32.totalorder %s333_s16, 1 }
   0xa   : > { %p637_p4 = por %p627_p1, %p53_p0  ;;  %p334_p5 = scmp.ge.s32.totalorder %s573_s14, 1 }
   0xb   : > { %p642_p6 = por %p111_p3, %p53_p0  ;;  %p118_p7 = scmp.lt.s32.totalorder %s573_s14, 3 }
   0xc   : > { %s132_s23 = sshll.u32 %s743_s1, 4  ;;  %p336_p9 = scmp.ge.s32.totalorder %s573_s14, 2  ;;  %s133_s23 = int_to_ptr.hbm [resolvable:$true] %s132_s23 }
   0xd   : > { %p650_p8 = pnand %p334_p5, %p118_p7  ;;  %s575_s25 = smov [#allocation5]  }
   0xe   : > { %s134_s26 = sshll.u32 %s575_s25, 4  ;;  %s28_s27 = sadd.s32 1, %s569_s13  ;;  %s135_s26 = int_to_ptr.vmem [resolvable:$true] %s134_s26 }
   0xf   : > { %p359_p10 = pneg %p650_p8  ;;  %p29_p12 = scmp.ge.s32.totalorder %s28_s27, 2 }
  0x10   : > { %s40_s28 = sadd.s32 1, %s561_s11  ;;  %p47_p13 = scmp.ne.s32.totalorder %s561_s11, %s557_s10 }
  0x11   : > { %p360_p11 = pnand %p359_p10, %p627_p1  ;;  %p48_p0 = scmp.eq.s32.totalorder %s573_s14, 0 }
  0x12   : > { %s758_s27 = smov (%p29_p12, %s28_s27), 0  ;;  %p672_p5 = por %p631_p2, %p47_p13 }
  0x13   : > { %362 = dma.hbm_to_vmem [thread:$0]  (!%p360_p11), %s133_s23, 32, %s135_s26, [#allocation6]  }
  0x14   : > { %p666_p3 = por %p48_p0, %p47_p13  ;;  %s36_s3 = ssub.s32 %s569_s13, %s758_s27 }
  0x15   : > { %p372_p7 = scmp.lt.s32.totalorder %s573_s14, 2  ;;  %p38_p10 = scmp.eq.s32.totalorder %s36_s3, 0 }
  0x16   : > { %s145_s4 = sand.u32 1, %s561_s11   ;;  %s349_s7 = sshll.u32 %s569_s13, 3 }
  0x17   : > { %s337_s5 = sshll.u32 %s145_s4, 3  ;;  %s156_s16 = scalar_lea.hbm %s742_s0, %s349_s7 }
  0x18   : > { %s681_s6 = scalar_select %p38_p10, %s561_s11, %s40_s28  }
  0x19   : > { %s149_s21 = scalar_lea.vmem [#allocation2], %s337_s5  ;;  %s158_s18 = sshll.u32 %s156_s16, 4  ;;  %s159_s18 = int_to_ptr.hbm [resolvable:$true] %s158_s18 }
  0x1a   : > { %s160_s22 = sshll.u32 %s149_s21, 4  ;;  %p364_p2 = pnand %p372_p7, %p666_p3  ;;  %s161_s22 = int_to_ptr.vmem [resolvable:$true] %s160_s22 }
  0x1b   : > { %s146_s23 = scalar_lea.sflag [#allocation3], %s145_s4  ;;  %169 = sbr.rel (%p650_p8) target bundleno = 159 (0x9f), region = 28 }
  0x1c   : > { %366 = dma.hbm_to_vmem [thread:$0]  (!%p364_p2), %s159_s18, 128, %s161_s22, %s146_s23  }
  0x1d   : > { %s692_s25 = sand.u32 (!%p650_p8), 1, %s557_s10  }
  0x1e   : > { %s341_s26 = sshll.u32 (!%p650_p8), %s692_s25, 3  ;;  %s172_s28 = scalar_lea.sflag (!%p650_p8), [#allocation3], %s692_s25 }
  0x1f   : > { %s175_s3 = scalar_lea.vmem (!%p650_p8), [#allocation2], %s341_s26 }
  0x20   : > { %540 = dma.done.wait (%p637_p4), %s172_s28, 128  }
  0x21   : > { %542 = vsyncadd (%p637_p4), %s172_s28, 4294967168 }
  0x22   : > { %544 = dma.done.wait (%p627_p1), [#allocation6], 32  }
  0x23   : > { %546 = vsyncadd (%p627_p1), [#allocation6], 4294967264  ;;  %v576_v0 = vmov 0   ;;  %v205_v1 = vld [vmem:[#allocation5] sm:$0x3]  ;;  %s350_s24 = sshll.u32 %s565_s12, 3 }
  0x24   : > { %426 = vset.pattern.permute.xlu0 %v576_v0  ;;  %v577_v2 = vmov 269488144   ;;  %s231_s19 = scalar_lea.hbm %s744_s2, %s350_s24  ;;  %v204_v6 = vld [vmem:[%s175_s3] sm:$0xff]  ;;  %s201_s5 = scalar_lea.vmem [#allocation7], %s341_s26 }
  0x25   : > { %208 = vperm.xlu0 %426, %v205_v1   ;;  %v211_v3 = vunpack.c.l.s4 %v577_v2  ;;  %s233_s17 = sshll.u32 %s201_s5, 4  ;;  %s235_s7 = sshll.u32 %s231_s19, 4  ;;  %s234_s17 = int_to_ptr.vmem [resolvable:$true] %s233_s17  ;;  %s236_s7 = int_to_ptr.hbm [resolvable:$true] %s235_s7 }
  0x26   : > { %s218_s8 = scalar_lea.sflag [#allocation4], %s692_s25  ;;  %s501_s15 = sshra.s32 %s236_s7, 4  ;;  %s502_s15 = int_to_ptr.hbm [resolvable:$true] %s501_s15 }
  0x27   : > { %v212_v4 = vunpack.c.0.s8 %v211_v3  ;;  %s503_s12 = scalar_lea.hbm %s502_s15, 8  ;;  %s507_s22 = scalar_lea.hbm %s744_s2, 16 }
  0x28   : > { %p504_p1 = scmp.ne.s32.totalorder %s502_s15, %s503_s12  ;;  %p508_p11 = scmp.lt.s32.totalorder %s502_s15, %s744_s2 }
  0x29   : > { %p509_p12 = scmp.lt.s32.totalorder %s507_s22, %s503_s12 }
  0x2a   : > { %p505_p4 = pnand %p504_p1, %p672_p5 }
  0x2b   : > { %p510_p13 = por %p509_p12, %p508_p11 }
  0x2c   : > { %p506_p8 = pneg %p505_p4 }
  0x2e   : > { %p511_p0 = pnand %p510_p13, %p506_p8 }
  0x97   : > { %v209_v5 = vpop.permute.xlu0 %208 }
  0x98   : > { %v213_v7 = vperm.slane %v209_v5, %v212_v4 }
  0x9a   : > { %v215_v8 = vmul.f32 %v213_v7, %v204_v6 }
  0x9c   : > { %216 = vst [vmem:[%s201_s5] sm:$0xff] %v215_v8 }
  0x9d   : > { %514 = shalt.err (!%p511_p0)
}
  0x9e   : > { %357 = dma.vmem_to_hbm [thread:$0]  (%p672_p5), %s234_s17, 128, %s236_s7, %s218_s8  }
  0x9f PF: > { %s247_s25 = sand.u32 1, %s553_s9   ;;  %p368_p3 = pnand %p336_p9, %p642_p6 }
  0xa0   : > { %s248_s26 = scalar_lea.sflag [#allocation4], %s247_s25 }
  0xa1   : > { %p369_p7 = pneg %p368_p3 }
  0xa3   : > { %548 = dma.done.wait (%p369_p7), %s248_s26, 128  }
  0xa4   : > { %550 = vsyncadd (%p369_p7), %s248_s26, 4294967168  ;;  %s19_s14 = sadd.s32 1, %s573_s14   ;;  %s752_s9 = smov %s557_s10 }
  0xa5   : > { %p16_p10 = scmp.ge.s32.totalorder %s19_s14, 4   ;;  %s753_s10 = smov %s561_s11 }
  0xa6   : > { %s754_s11 = smov %s681_s6  ;;  %s755_s12 = smov %s569_s13 }
  0xa7   : > { %s756_s13 = smov %s758_s27  ;;  %18 = sbr.rel (!%p16_p10) target bundleno = 7 (0x7), region = 78 }
  0xac   :  { %254 = vsyncpa [#allocation3], 1 }
  0xad   :  { %256 = vsyncpa [#allocation3 + $0x1], 1 }
  0xae   :  { %257 = vsyncpa [#allocation6], 1 }
  0xaf   :  { %258 = vsyncpa [#allocation4], 1 }
  0xb0   :  { %260 = vsyncpa [#allocation4 + $0x1], 1 }

</bundles_post_ra>
